<compile_context>
chip_gen: v7x
topology: tpu7x:2x2x1
jax: 0.10.0
libtpu: 0.0.40
codegen_flags: <defaults>
</compile_context>

<pallas_src>
import functools

import jax
import jax.numpy as jnp
from jax.experimental import pallas as pl
from jax.experimental.pallas import tpu as pltpu


def _round_up(n, m):
    return ((n + m - 1) // m) * m


def _device_kind():
    try:
        return jax.devices()[0].device_kind.lower()
    except Exception:
        return ""


def _default_mat_dtype(kind=None):
    kind = _device_kind() if kind is None else kind
    # v7x has no integer MXU path; quantized ints (|v| <= 127) are exact in bf16.
    if "v7" in kind or "7x" in kind:
        return jnp.bfloat16
    return jnp.int8


def _default_tiles(kind=None):
    """(tm, ti) defaults per chip generation."""
    kind = _device_kind() if kind is None else kind
    if "v7" in kind or "7x" in kind:
        return 256, 512      # 64 MiB VMEM: keep (widened) weight tiles modest
    if "v6" in kind:
        return 512, 1024     # larger tm flips prefill from DMA-bound to MXU-bound
    return 256, 1024         # v5e / default (128 MiB VMEM)


def _row_multiple(mat_dtype):
    return {1: 32, 2: 16}.get(jnp.dtype(mat_dtype).itemsize, 8)


def _quantize(v, inv_scale, dtype):
    # torch.round is round-half-to-even, same as jnp.round.  Cast straight to
    # the narrow MXU operand dtype (values are exact small integers after clip).
    return jnp.clip(jnp.round(v * inv_scale), -128.0, 127.0).astype(dtype)


def int8_llama_mlp_kernel(
    x_ref, wg_ref, wu_ref, wd_ref, bg_ref, bu_ref, bd_ref, o_ref, *scratch,
    gate_inv_scale, gate_alpha, up_inv_scale, up_alpha,
    down_inv_scale, down_alpha, mat_dtype, int_acc, share_qx, n_sub,
):
    mat_dtype = jnp.dtype(mat_dtype)
    is_int8 = mat_dtype == jnp.dtype(jnp.int8)
    gu_acc_dtype = jnp.int32 if is_int8 else jnp.float32

    it = iter(scratch)
    qxg_ref = next(it)
    qxu_ref = None if share_qx else next(it)
    acc_ref = next(it) if int_acc else None

    j = pl.program_id(1)

    @pl.when(j == 0)
    def _init():
        x = x_ref[...]                                   # (tm, H) f32
        # Quantize the token tile once; reuse it for every intermediate tile.
        qxg_ref[...] = _quantize(x, gate_inv_scale, mat_dtype)
        if not share_qx:
            qxu_ref[...] = _quantize(x, up_inv_scale, mat_dtype)
        if int_acc:
            acc_ref[...] = jnp.zeros_like(acc_ref)       # exact int32 accumulator
        else:
            # Fold the down-proj fp32 bias into the resident output tile.
            o_ref[...] = jnp.broadcast_to(bd_ref[...], o_ref.shape)

    qxg = qxg_ref[...]
    qxu = qxg if share_qx else qxu_ref[...]

    def widen(w):
        # Weights arrive as int8 from HBM; widen in VMEM only on the bf16/f32 path.
        return w if is_int8 else w.astype(mat_dtype)

    ti = wg_ref.shape[1]
    sub = ti // n_sub
    # Static sub-chunking: the SiLU/requant (VPU/EUP) epilogue of one chunk can
    # overlap the MXU dots of the other chunk.
    for c in range(n_sub):
        lo = c * sub
        wg = widen(wg_ref[:, pl.ds(lo, sub)])
        wu = widen(wu_ref[:, pl.ds(lo, sub)])
        wd = widen(wd_ref[pl.ds(lo, sub), :])

        g = gate_alpha * jnp.dot(
            qxg, wg, preferred_element_type=gu_acc_dtype
        ).astype(jnp.float32) + bg_ref[:, pl.ds(lo, sub)]
        u = up_alpha * jnp.dot(
            qxu, wu, preferred_element_type=gu_acc_dtype
        ).astype(jnp.float32) + bu_ref[:, pl.ds(lo, sub)]

        # TODO(synk): torch casts the gate output to float16 before SiLU; Mosaic
        # fp16 support is limited so SiLU is evaluated in fp32 here.
        hidden = (g * jax.nn.sigmoid(g)) * u             # (tm, sub) f32

        qh = _quantize(hidden, down_inv_scale, mat_dtype)
        if int_acc:
            # Exact: |partial| <= 127*127*I < 2^31 for Llama-sized I.
            acc_ref[...] += jnp.dot(qh, wd, preferred_element_type=jnp.int32)
        else:
            o_ref[...] += down_alpha * jnp.dot(
                qh, wd, preferred_element_type=jnp.float32)

    if int_acc:
        @pl.when(j == pl.num_programs(1) - 1)
        def _finalize():
            o_ref[...] = (down_alpha * acc_ref[...].astype(jnp.float32)
                          + jnp.broadcast_to(bd_ref[...], o_ref.shape))


def _vmem_limit_bytes(tm, ti, H, mat_dtype, int_acc, share_qx, n_sub):
    f32, w8 = 4, 1
    md = jnp.dtype(mat_dtype).itemsize
    # Double-buffered pipelined operands (weights stay int8 in HBM/VMEM).
    pipelined = 2 * (tm * H * f32            # x tile
                     + tm * H * f32          # out tile
                     + 2 * H * ti * w8       # gate + up weight tiles
                     + ti * H * w8           # down weight tile
                     + 2 * ti * f32          # gate / up bias tiles
                     + H * f32)              # down bias
    scratch = tm * H * md * (1 if share_qx else 2)
    if int_acc:
        scratch += tm * H * 4
    sub = max(ti // n_sub, 1)
    temps = 4 * tm * sub * f32               # g, u, hidden, qh in flight
    if md > 1:                               # widened weight sub-tiles (bf16/f32 path)
        temps += 3 * H * sub * md
    total = pipelined + scratch + temps
    return min(int(total * 1.5) + (8 << 20), 128 << 20)


def _mlp_pallas_call(x2, prepared, tm, vmem_limit_bytes):
    T_pad, H = x2.shape
    ti = prepared["ti"]
    I_pad = prepared["wg_t"].shape[1]
    mat_dtype = prepared["mat_dtype"]
    scales = prepared["scales"]

    int_acc = jnp.dtype(mat_dtype) == jnp.dtype(jnp.int8)
    share_qx = bool(scales["gate_inscale"] == scales["up_inscale"])
    n_sub = 2 if (ti >= 256 and ti % 256 == 0) else 1

    if vmem_limit_bytes is None:
        vmem_limit_bytes = _vmem_limit_bytes(tm, ti, H, mat_dtype, int_acc,
                                             share_qx, n_sub)

    kernel = functools.partial(
        int8_llama_mlp_kernel,
        gate_inv_scale=1.0 / scales["gate_inscale"], gate_alpha=scales["gate_alpha"],
        up_inv_scale=1.0 / scales["up_inscale"],     up_alpha=scales["up_alpha"],
        down_inv_scale=1.0 / scales["down_inscale"], down_alpha=scales["down_alpha"],
        mat_dtype=mat_dtype, int_acc=int_acc, share_qx=share_qx, n_sub=n_sub,
    )

    scratch_shapes = [pltpu.VMEM((tm, H), mat_dtype)]        # quantized x (gate scale)
    if not share_qx:
        scratch_shapes.append(pltpu.VMEM((tm, H), mat_dtype))  # quantized x (up scale)
    if int_acc:
        scratch_shapes.append(pltpu.VMEM((tm, H), jnp.int32))  # exact down-proj acc

    # NOTE: on v6e, if weight DMA is still exposed after raising tm, the three
    # weight BlockSpecs can take pipeline_mode=pl.Buffered(3) (skip on v7x).
    return pl.pallas_call(
        kernel,
        out_shape=jax.ShapeDtypeStruct((T_pad, H), jnp.float32),
        grid_spec=pltpu.PrefetchScalarGridSpec(
            num_scalar_prefetch=0,
            grid=(T_pad // tm, I_pad // ti),
            in_specs=[
                pl.BlockSpec((tm, H), lambda i, j: (i, 0)),   # x token tile (f32)
                pl.BlockSpec((H, ti), lambda i, j: (0, j)),   # gate weight tile (int8)
                pl.BlockSpec((H, ti), lambda i, j: (0, j)),   # up weight tile (int8)
                pl.BlockSpec((ti, H), lambda i, j: (j, 0)),   # down weight tile (int8)
                pl.BlockSpec((1, ti), lambda i, j: (0, j)),   # gate bias tile
                pl.BlockSpec((1, ti), lambda i, j: (0, j)),   # up bias tile
                pl.BlockSpec((1, H), lambda i, j: (0, 0)),    # down bias
            ],
            out_specs=pl.BlockSpec((tm, H), lambda i, j: (i, 0)),
            scratch_shapes=scratch_shapes,
        ),
        compiler_params=pltpu.CompilerParams(
            dimension_semantics=("parallel", "arbitrary"),
            vmem_limit_bytes=int(vmem_limit_bytes)),
    )(x2, prepared["wg_t"], prepared["wu_t"], prepared["wd_t"],
      prepared["bg"], prepared["bu"], prepared["bd"])


def prepare_int8_llama_mlp(params, scales, *, ti=None, mat_dtype=None):
    """One-time weight prep (run at model-load time, NOT per forward call).

    Transposes the int8 nn.Linear weights to [in, out], zero-pads the
    intermediate axis to a multiple of the intermediate tile `ti`, and records
    the MXU operand dtype for this device.  Weights stay int8 in HBM; on chips
    without an integer MXU (v7x) the kernel widens tiles to bf16 in VMEM.
    """
    kind = _device_kind()
    if mat_dtype is None:
        mat_dtype = _default_mat_dtype(kind)
    if ti is None:
        ti = _default_tiles(kind)[1]

    I, H = params["w_gate"].shape                        # [out, in] like nn.Linear
    ti_eff = min(ti, _round_up(I, 128))
    I_pad = _round_up(I, ti_eff)

    def pad_cols(a):
        return a if a.shape[1] == I_pad else jnp.pad(a, ((0, 0), (0, I_pad - a.shape[1])))

    def pad_rows(a):
        return a if a.shape[0] == I_pad else jnp.pad(a, ((0, I_pad - a.shape[0]), (0, 0)))

    return {
        "wg_t": pad_cols(params["w_gate"].T.astype(jnp.int8)),   # (H, I_pad) int8
        "wu_t": pad_cols(params["w_up"].T.astype(jnp.int8)),     # (H, I_pad) int8
        "wd_t": pad_rows(params["w_down"].T.astype(jnp.int8)),   # (I_pad, H) int8
        "bg":   pad_cols(params["b_gate"].astype(jnp.float32)),  # (1, I_pad) f32
        "bu":   pad_cols(params["b_up"].astype(jnp.float32)),
        "bd":   params["b_down"].astype(jnp.float32),            # (1, H) f32
        "scales": dict(scales),
        "ti": ti_eff,
        "hidden_size": H,
        "intermediate_size": I,
        "mat_dtype": mat_dtype,
    }


def int8_llama_mlp(x, prepared, *, tm=None, vmem_limit_bytes=None):
    """x: [B, S, H] float32 -> [B, S, H] float32 (fused SmoothQuant Llama MLP)."""
    B, S, H = x.shape
    assert H == prepared["hidden_size"]
    if tm is None:
        tm = _default_tiles()[0]

    row_mult = _row_multiple(prepared["mat_dtype"])
    T = B * S
    tm_eff = max(row_mult, min(_round_up(tm, row_mult), _round_up(T, row_mult)))
    T_pad = _round_up(T, tm_eff)

    x2 = x.reshape(T, H).astype(jnp.float32)
    if T_pad != T:
        x2 = jnp.pad(x2, ((0, T_pad - T), (0, 0)))

    out = _mlp_pallas_call(x2, prepared, tm_eff, vmem_limit_bytes)
    return out[:T].reshape(B, S, H)


def reference_mlp(x, params, scales):
    """Pure-JAX reference of the same int8 MLP semantics (fp32 SiLU)."""
    B, S, H = x.shape
    x2 = x.reshape(-1, H).astype(jnp.float32)

    def lin(v, w, b, inscale, alpha):
        q = jnp.clip(jnp.round(v * (1.0 / inscale)), -128.0, 127.0)
        return alpha * (q @ w.astype(jnp.float32).T) + b

    g = lin(x2, params["w_gate"], params["b_gate"],
            scales["gate_inscale"], scales["gate_alpha"])
    u = lin(x2, params["w_up"], params["b_up"],
            scales["up_inscale"], scales["up_alpha"])
    h = (g * jax.nn.sigmoid(g)) * u
    out = lin(h, params["w_down"], params["b_down"],
              scales["down_inscale"], scales["down_alpha"])
    return out.reshape(B, S, H)


if __name__ == "__main__":
    # Small LlamaConfig-like sizes.  intermediate_size=448 with ti=256 exercises
    # intermediate-axis padding (-> 512) and the in-kernel 2-way sub-chunking;
    # tm=32 with 64 tokens exercises the parallel token grid axis (grid = (2, 2)).
    batch, seq = 2, 32
    hidden_size, intermediate_size = 32, 448

    key = jax.random.PRNGKey(0)
    kx, kg, ku, kd, kbg, kbu, kbd = jax.random.split(key, 7)

    x = (0.5 * jax.random.normal(kx, (batch, seq, hidden_size))).astype(jnp.float32)

    params = {
        # int8 weights, shape [out_features, in_features] like nn.Linear
        "w_gate": jax.random.randint(kg, (intermediate_size, hidden_size), -127, 128, jnp.int32).astype(jnp.int8),
        "w_up":   jax.random.randint(ku, (intermediate_size, hidden_size), -127, 128, jnp.int32).astype(jnp.int8),
        "w_down": jax.random.randint(kd, (hidden_size, intermediate_size), -127, 128, jnp.int32).astype(jnp.int8),
        # fp32 biases, shape (1, out_features) as in W8A8BFP32OFP32Linear
        "b_gate": (0.1 * jax.random.normal(kbg, (1, intermediate_size))).astype(jnp.float32),
        "b_up":   (0.1 * jax.random.normal(kbu, (1, intermediate_size))).astype(jnp.float32),
        "b_down": (0.1 * jax.random.normal(kbd, (1, hidden_size))).astype(jnp.float32),
    }
    scales = {
        "gate_inscale": 0.04, "gate_alpha": 3.0e-4,
        "up_inscale":   0.05, "up_alpha":   2.5e-4,
        "down_inscale": 0.02, "down_alpha": 4.0e-4,
    }

    prepared = prepare_int8_llama_mlp(params, scales, ti=256)   # one-time weight prep
    out = int8_llama_mlp(x, prepared, tm=32)
    out = jax.block_until_ready(out)

    ref = reference_mlp(x, params, scales)
    assert out.shape == (batch, seq, hidden_size) and out.dtype == jnp.float32

    err = jnp.abs(out - ref)
    # ULP differences in the SiLU transcendental (in-kernel vs XLA lowering) can
    # flip a rounding boundary in the hidden re-quantization for a few elements;
    # each flip moves an output element by at most one LSB = down_alpha * 127.
    lsb = scales["down_alpha"] * 127.0
    assert float(jnp.max(err)) <= 4.0 * lsb + 1e-4, f"max err {float(jnp.max(err))}"
    assert float(jnp.median(err)) <= 1e-5, f"median err {float(jnp.median(err))}"

    print("KERNEL_OK")
</pallas_src>

<mosaic_0001>
module attributes {stable_mosaic.version = 11 : i64} {
  func.func @int8_llama_mlp_kernel(%arg0: i32, %arg1: i32, %arg2: memref<32x32xf32, #tpu.memory_space<vmem>>, %arg3: memref<32x256xi8, #tpu.memory_space<vmem>>, %arg4: memref<32x256xi8, #tpu.memory_space<vmem>>, %arg5: memref<256x32xi8, #tpu.memory_space<vmem>>, %arg6: memref<1x256xf32, #tpu.memory_space<vmem>>, %arg7: memref<1x256xf32, #tpu.memory_space<vmem>>, %arg8: memref<1x32xf32, #tpu.memory_space<vmem>>, %arg9: memref<32x32xf32, #tpu.memory_space<vmem>>, %arg10: memref<32x32xi8, #tpu.memory_space<vmem>>, %arg11: memref<32x32xi8, #tpu.memory_space<vmem>>, %arg12: memref<32x32xi32, #tpu.memory_space<vmem>>) attributes {dimension_semantics = [#tpu.dimension_semantics<parallel>, #tpu.dimension_semantics<arbitrary>], iteration_bounds = array<i64: 2, 2>, scalar_prefetch = 0 : i64, scratch_operands = 3 : i64, tpu.core_type = #tpu.core_type<tc>, window_params = [{transform_indices = @transform_0, window_bounds = array<i64: 32, 32>}, {transform_indices = @transform_1, window_bounds = array<i64: 32, 256>}, {transform_indices = @transform_2, window_bounds = array<i64: 32, 256>}, {transform_indices = @transform_3, window_bounds = array<i64: 256, 32>}, {transform_indices = @transform_4, window_bounds = array<i64: 1, 256>}, {transform_indices = @transform_5, window_bounds = array<i64: 1, 256>}, {pipeline_mode = #tpu.pipeline_mode<synchronous>, transform_indices = @transform_6, window_bounds = array<i64: 1, 32>}, {transform_indices = @transform_7, window_bounds = array<i64: 32, 32>}]} {
    %c0_i32 = arith.constant 0 : i32
    %0 = arith.cmpi eq, %arg1, %c0_i32 : i32
    %1 = arith.extui %0 : i1 to i32
    %c0_i32_0 = arith.constant 0 : i32
    %2 = arith.cmpi ne, %1, %c0_i32_0 : i32
    scf.if %2 {
      %c0_49 = arith.constant 0 : index
      %c0_50 = arith.constant 0 : index
      %80 = vector.load %arg2[%c0_49, %c0_50] : memref<32x32xf32, #tpu.memory_space<vmem>>, vector<32x32xf32>
      %cst_51 = arith.constant 2.500000e+01 : f32
      %81 = vector.broadcast %cst_51 : f32 to vector<32x32xf32>
      %82 = arith.mulf %80, %81 : vector<32x32xf32>
      %83 = math.roundeven %82 : vector<32x32xf32>
      %cst_52 = arith.constant -1.280000e+02 : f32
      %cst_53 = arith.constant 1.270000e+02 : f32
      %84 = vector.broadcast %cst_52 : f32 to vector<32x32xf32>
      %85 = arith.maximumf %84, %83 : vector<32x32xf32>
      %86 = vector.broadcast %cst_53 : f32 to vector<32x32xf32>
      %87 = arith.minimumf %86, %85 : vector<32x32xf32>
      %88 = arith.fptosi %87 : vector<32x32xf32> to vector<32x32xi8>
      %c0_54 = arith.constant 0 : index
      %c0_55 = arith.constant 0 : index
      %89 = vector.load %arg10[%c0_54, %c0_55] : memref<32x32xi8, #tpu.memory_space<vmem>>, vector<32x32xi8>
      tpu.vector_store %arg10[%c0_54, %c0_55], %88 {strides = array<i32>} : memref<32x32xi8, #tpu.memory_space<vmem>>, vector<32x32xi8>,
      %cst_56 = arith.constant 2.000000e+01 : f32
      %90 = vector.broadcast %cst_56 : f32 to vector<32x32xf32>
      %91 = arith.mulf %80, %90 : vector<32x32xf32>
      %92 = math.roundeven %91 : vector<32x32xf32>
      %cst_57 = arith.constant -1.280000e+02 : f32
      %cst_58 = arith.constant 1.270000e+02 : f32
      %93 = vector.broadcast %cst_57 : f32 to vector<32x32xf32>
      %94 = arith.maximumf %93, %92 : vector<32x32xf32>
      %95 = vector.broadcast %cst_58 : f32 to vector<32x32xf32>
      %96 = arith.minimumf %95, %94 : vector<32x32xf32>
      %97 = arith.fptosi %96 : vector<32x32xf32> to vector<32x32xi8>
      %c0_59 = arith.constant 0 : index
      %c0_60 = arith.constant 0 : index
      %98 = vector.load %arg11[%c0_59, %c0_60] : memref<32x32xi8, #tpu.memory_space<vmem>>, vector<32x32xi8>
      tpu.vector_store %arg11[%c0_59, %c0_60], %97 {strides = array<i32>} : memref<32x32xi8, #tpu.memory_space<vmem>>, vector<32x32xi8>,
      %c0_i32_61 = arith.constant 0 : i32
      %99 = vector.broadcast %c0_i32_61 : i32 to vector<32x32xi32>
      %c0_62 = arith.constant 0 : index
      %c0_63 = arith.constant 0 : index
      %100 = vector.load %arg12[%c0_62, %c0_63] : memref<32x32xi32, #tpu.memory_space<vmem>>, vector<32x32xi32>
      tpu.vector_store %arg12[%c0_62, %c0_63], %99 {strides = array<i32>} : memref<32x32xi32, #tpu.memory_space<vmem>>, vector<32x32xi32>,
    } else {
    }
    %c0 = arith.constant 0 : index
    %c0_1 = arith.constant 0 : index
    %3 = vector.load %arg10[%c0, %c0_1] : memref<32x32xi8, #tpu.memory_space<vmem>>, vector<32x32xi8>
    %c0_2 = arith.constant 0 : index
    %c0_3 = arith.constant 0 : index
    %4 = vector.load %arg11[%c0_2, %c0_3] : memref<32x32xi8, #tpu.memory_space<vmem>>, vector<32x32xi8>
    %c0_4 = arith.constant 0 : index
    %c0_5 = arith.constant 0 : index
    %5 = vector.load %arg3[%c0_4, %c0_5] : memref<32x256xi8, #tpu.memory_space<vmem>>, vector<32x128xi8>
    %c0_6 = arith.constant 0 : index
    %c0_7 = arith.constant 0 : index
    %6 = vector.load %arg4[%c0_6, %c0_7] : memref<32x256xi8, #tpu.memory_space<vmem>>, vector<32x128xi8>
    %c0_8 = arith.constant 0 : index
    %c0_9 = arith.constant 0 : index
    %7 = vector.load %arg5[%c0_8, %c0_9] : memref<256x32xi8, #tpu.memory_space<vmem>>, vector<128x32xi8>
    %cst = arith.constant dense<0> : vector<32x128xi32>
    %8 = tpu.matmul %3, %5, %cst {dimension_numbers = #tpu.dot_dimension_numbers<[1], [0], [0], [1], [0, 0, 1, 1], [], []>} : vector<32x32xi8>, vector<32x128xi8>, vector<32x128xi32> -> vector<32x128xi32>
    %9 = arith.sitofp %8 : vector<32x128xi32> to vector<32x128xf32>
    %cst_10 = arith.constant 3.000000e-04 : f32
    %10 = vector.broadcast %cst_10 : f32 to vector<32x128xf32>
    %11 = arith.mulf %10, %9 : vector<32x128xf32>
    %c0_11 = arith.constant 0 : index
    %c0_12 = arith.constant 0 : index
    %12 = vector.load %arg6[%c0_11, %c0_12] : memref<1x256xf32, #tpu.memory_space<vmem>>, vector<1x128xf32>
    %13 = vector.broadcast %12 : vector<1x128xf32> to vector<32x128xf32>
    %14 = arith.addf %11, %13 : vector<32x128xf32>
    %cst_13 = arith.constant dense<0> : vector<32x128xi32>
    %15 = tpu.matmul %4, %6, %cst_13 {dimension_numbers = #tpu.dot_dimension_numbers<[1], [0], [0], [1], [0, 0, 1, 1], [], []>} : vector<32x32xi8>, vector<32x128xi8>, vector<32x128xi32> -> vector<32x128xi32>
    %16 = arith.sitofp %15 : vector<32x128xi32> to vector<32x128xf32>
    %cst_14 = arith.constant 2.500000e-04 : f32
    %17 = vector.broadcast %cst_14 : f32 to vector<32x128xf32>
    %18 = arith.mulf %17, %16 : vector<32x128xf32>
    %c0_15 = arith.constant 0 : index
    %c0_16 = arith.constant 0 : index
    %19 = vector.load %arg7[%c0_15, %c0_16] : memref<1x256xf32, #tpu.memory_space<vmem>>, vector<1x128xf32>
    %20 = vector.broadcast %19 : vector<1x128xf32> to vector<32x128xf32>
    %21 = arith.addf %18, %20 : vector<32x128xf32>
    %22 = arith.negf %14 : vector<32x128xf32>
    %23 = math.exp %22 : vector<32x128xf32>
    %cst_17 = arith.constant 1.000000e+00 : f32
    %24 = vector.broadcast %cst_17 : f32 to vector<32x128xf32>
    %25 = arith.addf %24, %23 : vector<32x128xf32>
    %26 = arith.divf %24, %25 : vector<32x128xf32>
    %27 = arith.mulf %14, %26 : vector<32x128xf32>
    %28 = arith.mulf %27, %21 : vector<32x128xf32>
    %cst_18 = arith.constant 5.000000e+01 : f32
    %29 = vector.broadcast %cst_18 : f32 to vector<32x128xf32>
    %30 = arith.mulf %28, %29 : vector<32x128xf32>
    %31 = math.roundeven %30 : vector<32x128xf32>
    %cst_19 = arith.constant -1.280000e+02 : f32
    %cst_20 = arith.constant 1.270000e+02 : f32
    %32 = vector.broadcast %cst_19 : f32 to vector<32x128xf32>
    %33 = arith.maximumf %32, %31 : vector<32x128xf32>
    %34 = vector.broadcast %cst_20 : f32 to vector<32x128xf32>
    %35 = arith.minimumf %34, %33 : vector<32x128xf32>
    %36 = arith.fptosi %35 : vector<32x128xf32> to vector<32x128xi8>
    %c0_21 = arith.constant 0 : index
    %c0_22 = arith.constant 0 : index
    %37 = vector.load %arg12[%c0_21, %c0_22] : memref<32x32xi32, #tpu.memory_space<vmem>>, vector<32x32xi32>
    %cst_23 = arith.constant dense<0> : vector<32x32xi32>
    %38 = tpu.matmul %36, %7, %cst_23 {dimension_numbers = #tpu.dot_dimension_numbers<[1], [0], [0], [1], [0, 0, 1, 1], [], []>} : vector<32x128xi8>, vector<128x32xi8>, vector<32x32xi32> -> vector<32x32xi32>
    %39 = arith.addi %37, %38 : vector<32x32xi32>
    %c0_24 = arith.constant 0 : index
    %c0_25 = arith.constant 0 : index
    %40 = vector.load %arg12[%c0_24, %c0_25] : memref<32x32xi32, #tpu.memory_space<vmem>>, vector<32x32xi32>
    tpu.vector_store %arg12[%c0_24, %c0_25], %39 {strides = array<i32>} : memref<32x32xi32, #tpu.memory_space<vmem>>, vector<32x32xi32>,
    %c0_26 = arith.constant 0 : index
    %c128 = arith.constant 128 : index
    %41 = vector.load %arg3[%c0_26, %c128] : memref<32x256xi8, #tpu.memory_space<vmem>>, vector<32x128xi8>
    %c0_27 = arith.constant 0 : index
    %c128_28 = arith.constant 128 : index
    %42 = vector.load %arg4[%c0_27, %c128_28] : memref<32x256xi8, #tpu.memory_space<vmem>>, vector<32x128xi8>
    %c128_29 = arith.constant 128 : index
    %c0_30 = arith.constant 0 : index
    %43 = vector.load %arg5[%c128_29, %c0_30] : memref<256x32xi8, #tpu.memory_space<vmem>>, vector<128x32xi8>
    %cst_31 = arith.constant dense<0> : vector<32x128xi32>
    %44 = tpu.matmul %3, %41, %cst_31 {dimension_numbers = #tpu.dot_dimension_numbers<[1], [0], [0], [1], [0, 0, 1, 1], [], []>} : vector<32x32xi8>, vector<32x128xi8>, vector<32x128xi32> -> vector<32x128xi32>
    %45 = arith.sitofp %44 : vector<32x128xi32> to vector<32x128xf32>
    %cst_32 = arith.constant 3.000000e-04 : f32
    %46 = vector.broadcast %cst_32 : f32 to vector<32x128xf32>
    %47 = arith.mulf %46, %45 : vector<32x128xf32>
    %c0_33 = arith.constant 0 : index
    %c128_34 = arith.constant 128 : index
    %48 = vector.load %arg6[%c0_33, %c128_34] : memref<1x256xf32, #tpu.memory_space<vmem>>, vector<1x128xf32>
    %49 = vector.broadcast %48 : vector<1x128xf32> to vector<32x128xf32>
    %50 = arith.addf %47, %49 : vector<32x128xf32>
    %cst_35 = arith.constant dense<0> : vector<32x128xi32>
    %51 = tpu.matmul %4, %42, %cst_35 {dimension_numbers = #tpu.dot_dimension_numbers<[1], [0], [0], [1], [0, 0, 1, 1], [], []>} : vector<32x32xi8>, vector<32x128xi8>, vector<32x128xi32> -> vector<32x128xi32>
    %52 = arith.sitofp %51 : vector<32x128xi32> to vector<32x128xf32>
    %cst_36 = arith.constant 2.500000e-04 : f32
    %53 = vector.broadcast %cst_36 : f32 to vector<32x128xf32>
    %54 = arith.mulf %53, %52 : vector<32x128xf32>
    %c0_37 = arith.constant 0 : index
    %c128_38 = arith.constant 128 : index
    %55 = vector.load %arg7[%c0_37, %c128_38] : memref<1x256xf32, #tpu.memory_space<vmem>>, vector<1x128xf32>
    %56 = vector.broadcast %55 : vector<1x128xf32> to vector<32x128xf32>
    %57 = arith.addf %54, %56 : vector<32x128xf32>
    %58 = arith.negf %50 : vector<32x128xf32>
    %59 = math.exp %58 : vector<32x128xf32>
    %cst_39 = arith.constant 1.000000e+00 : f32
    %60 = vector.broadcast %cst_39 : f32 to vector<32x128xf32>
    %61 = arith.addf %60, %59 : vector<32x128xf32>
    %62 = arith.divf %60, %61 : vector<32x128xf32>
    %63 = arith.mulf %50, %62 : vector<32x128xf32>
    %64 = arith.mulf %63, %57 : vector<32x128xf32>
    %cst_40 = arith.constant 5.000000e+01 : f32
    %65 = vector.broadcast %cst_40 : f32 to vector<32x128xf32>
    %66 = arith.mulf %64, %65 : vector<32x128xf32>
    %67 = math.roundeven %66 : vector<32x128xf32>
    %cst_41 = arith.constant -1.280000e+02 : f32
    %cst_42 = arith.constant 1.270000e+02 : f32
    %68 = vector.broadcast %cst_41 : f32 to vector<32x128xf32>
    %69 = arith.maximumf %68, %67 : vector<32x128xf32>
    %70 = vector.broadcast %cst_42 : f32 to vector<32x128xf32>
    %71 = arith.minimumf %70, %69 : vector<32x128xf32>
    %72 = arith.fptosi %71 : vector<32x128xf32> to vector<32x128xi8>
    %c0_43 = arith.constant 0 : index
    %c0_44 = arith.constant 0 : index
    %73 = vector.load %arg12[%c0_43, %c0_44] : memref<32x32xi32, #tpu.memory_space<vmem>>, vector<32x32xi32>
    %cst_45 = arith.constant dense<0> : vector<32x32xi32>
    %74 = tpu.matmul %72, %43, %cst_45 {dimension_numbers = #tpu.dot_dimension_numbers<[1], [0], [0], [1], [0, 0, 1, 1], [], []>} : vector<32x128xi8>, vector<128x32xi8>, vector<32x32xi32> -> vector<32x32xi32>
    %75 = arith.addi %73, %74 : vector<32x32xi32>
    %c0_46 = arith.constant 0 : index
    %c0_47 = arith.constant 0 : index
    %76 = vector.load %arg12[%c0_46, %c0_47] : memref<32x32xi32, #tpu.memory_space<vmem>>, vector<32x32xi32>
    tpu.vector_store %arg12[%c0_46, %c0_47], %75 {strides = array<i32>} : memref<32x32xi32, #tpu.memory_space<vmem>>, vector<32x32xi32>,
    %c1_i32 = arith.constant 1 : i32
    %77 = arith.cmpi eq, %arg1, %c1_i32 : i32
    %78 = arith.extui %77 : i1 to i32
    %c0_i32_48 = arith.constant 0 : i32
    %79 = arith.cmpi ne, %78, %c0_i32_48 : i32
    scf.if %79 {
      %c0_49 = arith.constant 0 : index
      %c0_50 = arith.constant 0 : index
      %80 = vector.load %arg12[%c0_49, %c0_50] : memref<32x32xi32, #tpu.memory_space<vmem>>, vector<32x32xi32>
      %81 = arith.sitofp %80 : vector<32x32xi32> to vector<32x32xf32>
      %cst_51 = arith.constant 4.000000e-04 : f32
      %82 = vector.broadcast %cst_51 : f32 to vector<32x32xf32>
      %83 = arith.mulf %82, %81 : vector<32x32xf32>
      %c0_52 = arith.constant 0 : index
      %c0_53 = arith.constant 0 : index
      %84 = vector.load %arg8[%c0_52, %c0_53] : memref<1x32xf32, #tpu.memory_space<vmem>>, vector<1x32xf32>
      %85 = vector.shape_cast %84 : vector<1x32xf32> to vector<1x32xf32>
      %86 = vector.broadcast %85 : vector<1x32xf32> to vector<32x32xf32>
      %87 = arith.addf %83, %86 : vector<32x32xf32>
      %c0_54 = arith.constant 0 : index
      %c0_55 = arith.constant 0 : index
      %88 = vector.load %arg9[%c0_54, %c0_55] : memref<32x32xf32, #tpu.memory_space<vmem>>, vector<32x32xf32>
      tpu.vector_store %arg9[%c0_54, %c0_55], %87 {strides = array<i32>} : memref<32x32xf32, #tpu.memory_space<vmem>>, vector<32x32xf32>,
    } else {
    }
    return
  }
  func.func @transform_0(%arg0: i32, %arg1: i32) -> (i32, i32) {
    %c0_i32 = arith.constant 0 : i32
    %c0_i32_0 = arith.constant 0 : i32
    return %arg0, %c0_i32 : i32, i32
  }
  func.func @transform_1(%arg0: i32, %arg1: i32) -> (i32, i32) {
    %c0_i32 = arith.constant 0 : i32
    %c0_i32_0 = arith.constant 0 : i32
    return %c0_i32, %arg1 : i32, i32
  }
  func.func @transform_2(%arg0: i32, %arg1: i32) -> (i32, i32) {
    %c0_i32 = arith.constant 0 : i32
    %c0_i32_0 = arith.constant 0 : i32
    return %c0_i32, %arg1 : i32, i32
  }
  func.func @transform_3(%arg0: i32, %arg1: i32) -> (i32, i32) {
    %c0_i32 = arith.constant 0 : i32
    %c0_i32_0 = arith.constant 0 : i32
    return %arg1, %c0_i32 : i32, i32
  }
  func.func @transform_4(%arg0: i32, %arg1: i32) -> (i32, i32) {
    %c0_i32 = arith.constant 0 : i32
    %c0_i32_0 = arith.constant 0 : i32
    return %c0_i32, %arg1 : i32, i32
  }
  func.func @transform_5(%arg0: i32, %arg1: i32) -> (i32, i32) {
    %c0_i32 = arith.constant 0 : i32
    %c0_i32_0 = arith.constant 0 : i32
    return %c0_i32, %arg1 : i32, i32
  }
  func.func @transform_6(%arg0: i32, %arg1: i32) -> (i32, i32) {
    %c0_i32 = arith.constant 0 : i32
    %c0_i32_0 = arith.constant 0 : i32
    %c0_i32_1 = arith.constant 0 : i32
    return %c0_i32, %c0_i32_0 : i32, i32
  }
  func.func @transform_7(%arg0: i32, %arg1: i32) -> (i32, i32) {
    %c0_i32 = arith.constant 0 : i32
    %c0_i32_0 = arith.constant 0 : i32
    return %arg0, %c0_i32 : i32, i32
  }
}

</mosaic_0001>

<bundles_post_ra>
// kernel: tpu_custom_call.1
= control target key start
LH: loop header
LB: loop body
LE: loop exit
PB: predicated region body
PF: predicated region fallthrough
CT: control target
= control target key end

     0   :  { %s1597_s24 = smov 0   ;;  %s1599_s25 = smov 0   ;;  %s1762_s0 = inlined_call_operand.vmem [shape: f32[64,32], index: 0, kind: input, shape index: {}]   ;;  %s1763_s1 = inlined_call_operand.vmem [shape: s8[32,512], index: 1, kind: input, shape index: {}]   ;;  %s1764_s2 = inlined_call_operand.vmem [shape: s8[32,512], index: 2, kind: input, shape index: {}]   ;;  %s1765_s3 = inlined_call_operand.vmem [shape: s8[512,32], index: 3, kind: input, shape index: {}]   ;;  %s1766_s4 = inlined_call_operand.vmem [shape: f32[1,512], index: 4, kind: input, shape index: {}]   ;;  %s1767_s5 = inlined_call_operand.vmem [shape: f32[1,512], index: 5, kind: input, shape index: {}]   ;;  %s1768_s6 = inlined_call_operand.vmem [shape: f32[1,32], index: 6, kind: input, shape index: {}]   ;;  %s1769_s7 = inlined_call_operand.vmem [shape: f32[64,32], index: 7, kind: output, shape index: {}]  }
   0x1   :  { %1770 = sst [smem:[#allocation5_spill]] %s1762_s0  ;;  %s1601_s26 = smov 0  }
   0x2   :  { %1771 = sst [smem:[#allocation6_spill]] %s1763_s1  ;;  %s1603_s27 = smov 0  }
   0x3   :  { %s1605_s28 = smov 0  }
   0x4 LB: > { %s26_s29 = sadd.s32 1, %s1546_s26  ;;  %s29_s30 = sadd.s32 1, %s1550_s27  ;;  %s1554_s28 = sphi %s1605_s28, %s17_s28   ;;  %s1550_s27 = sphi %s1603_s27, %s1777_s27   ;;  %s1546_s26 = sphi %s1601_s26, %s1776_s26   ;;  %s1542_s25 = sphi %s1599_s25, %s1775_s25   ;;  %s1538_s24 = sphi %s1597_s24, %s1774_s24  }
   0x5   : > { %p27_p0 = scmp.ge.s32.totalorder %s26_s29, 2  ;;  %p1233_p1 = scmp.ge.s32.totalorder %s1554_s28, 1 }
   0x6   : > { %p303_p2 = scmp.lt.s32.totalorder %s1554_s28, 5 }
   0x7   : > { %s1779_s29 = smov (%p27_p0, %s26_s29), 0  ;;  %s1781_s30 = smov (!%p27_p0, %s29_s30), %s1550_s27 }
   0x8   : > { %p304_p3 = pnand %p1233_p1, %p303_p2  ;;  %p31_p4 = scmp.ge.s32.totalorder %s1781_s30, 2 }
   0x9   : > { %s1234_s8 = sshll.u32 (!%p304_p3), %s1542_s25, 2  ;;  %s1236_s9 = sshll.u32 (!%p304_p3), %s1538_s24, 1 }
   0xa   : > { %s1783_s30 = smov (%p31_p4, %s1781_s30), 0  ;;  %307 = sbr.rel (%p304_p3) target bundleno = 571 (0x23b), region = 48 }
   0xb   : > { %p359_p5 = scmp.lt.s32.totalorder (!%p304_p3), %s1234_s8, 7  ;;  %p365_p6 = scmp.lt.s32.totalorder (!%p304_p3), %s1236_s9, 3 }
   0xc   : > { %s1240_s10 = sshll.u32 (!%p304_p3), %s1538_s24, 3  ;;  %s1772_s0 = sld [smem:[#allocation5_spill]] (!%p304_p3) }
   0xd   : > { %p377_p7 = scmp.lt.s32.totalorder (!%p304_p3), %s1240_s10, 15  ;;  %s1773_s1 = sld [smem:[#allocation6_spill]] (!%p304_p3) }
   0xe   : > { %p1246_p8 = scmp.ne.s32.totalorder (!%p304_p3), %s1538_s24, 0 }
  0x11   : > { %s1785_s8 = smov (!%p359_p5, %s1234_s8), 7  ;;  %s1787_s9 = smov (!%p365_p6, %s1236_s9), 3 }
  0x12   : > { %s1235_s11 = sshll.u32 %s1785_s8, 3  ;;  %s1237_s15 = sshll.u32 %s1787_s9, 3  ;;  %vm437_vm0 = vcmask (!%p1246_p8), 261120   ;;  %v1556_v8 = vmov (!%p1246_p8), 0  }
  0x13   : > { %s362_s14 = scalar_lea.vmem %s1772_s0, %s1235_s11  ;;  %s1637_s18 = scalar_lea.vmem %s1773_s1, %s1237_s15  ;;  %470 = vst.msk [vmem:[#allocation4] sm:$0xff] (!%p1246_p8), %vm437_vm0, %v1556_v8  ;;  %471 = vst.msk [vmem:[#allocation4 + $0x8] sm:$0xff] (!%p1246_p8), %vm437_vm0, %v1556_v8 }
  0x14   : > { %s1642_s21 = scalar_lea.vmem %s1764_s2, %s1237_s15  ;;  %s1789_s10 = smov (!%p377_p7, %s1240_s10), 15  ;;  %v403_v0 = vld [vmem:[%s362_s14] sm:$0xff] (!%p1246_p8)  ;;  %v404_v1 = vld [vmem:[%s362_s14 + $0x8] sm:$0xff] (!%p1246_p8)  ;;  %v405_v2 = vld [vmem:[%s362_s14 + $0x10] sm:$0xff] (!%p1246_p8)  ;;  %472 = vst.msk [vmem:[#allocation4 + $0x10] sm:$0xff] (!%p1246_p8), %vm437_vm0, %v1556_v8 }
  0x15   : > { %s1647_s25 = scalar_lea.vmem %s1766_s4, %s1787_s9  ;;  %s1652_s13 = scalar_lea.vmem %s1767_s5, %s1787_s9  ;;  %v406_v3 = vld [vmem:[%s362_s14 + $0x18] sm:$0xff] (!%p1246_p8)  ;;  %v407_v4 = vmul.f32 (!%p1246_p8), 25.0, %v403_v0  ;;  %v408_v5 = vmul.f32 (!%p1246_p8), 25.0, %v404_v1  ;;  %v409_v6 = vmul.f32 (!%p1246_p8), 25.0, %v405_v2  ;;  %v439_v7 = vmul.f32 (!%p1246_p8), 20.0, %v403_v0  ;;  %473 = vst.msk [vmem:[#allocation4 + $0x18] sm:$0xff] (!%p1246_p8), %vm437_vm0, %v1556_v8 }
  0x16   : > { %s1241_s0 = sshll.u32 %s1789_s10, 3  ;;  %s1657_s1 = scalar_lea.vmem %s1769_s7, %s1235_s11  ;;  %v410_v9 = vmul.f32 (!%p1246_p8), 25.0, %v406_v3  ;;  %v440_v10 = vmul.f32 (!%p1246_p8), 20.0, %v404_v1  ;;  %v441_v11 = vmul.f32 (!%p1246_p8), 20.0, %v405_v2  ;;  %v442_v12 = vmul.f32 (!%p1246_p8), 20.0, %v406_v3 }
  0x17   : > { %s1662_s20 = scalar_lea.vmem %s1765_s3, %s1241_s0  ;;  %402 = sbr.rel (%p1246_p8) target bundleno = 38 (0x26), region = 52  ;;  %v1379_v13 = vround.rtne.f32 (!%p1246_p8), %v407_v4  ;;  %v1380_v14 = vround.rtne.f32 (!%p1246_p8), %v408_v5  ;;  %v1381_v15 = vround.rtne.f32 (!%p1246_p8), %v409_v6  ;;  %v1383_v16 = vround.rtne.f32 (!%p1246_p8), %v439_v7 }
  0x18   : > { %v1382_v17 = vround.rtne.f32 (!%p1246_p8), %v410_v9  ;;  %v1384_v18 = vround.rtne.f32 (!%p1246_p8), %v440_v10  ;;  %v1385_v19 = vround.rtne.f32 (!%p1246_p8), %v441_v11  ;;  %v1386_v20 = vround.rtne.f32 (!%p1246_p8), %v442_v12 }
  0x19   : > { %v415_v21 = vmax.f32 (!%p1246_p8), %v1379_v13, -128.0  ;;  %v416_v22 = vmax.f32 (!%p1246_p8), %v1380_v14, -128.0  ;;  %v417_v23 = vmax.f32 (!%p1246_p8), %v1381_v15, -128.0  ;;  %v447_v24 = vmax.f32 (!%p1246_p8), %v1383_v16, -128.0 }
  0x1a   : > { %v418_v25 = vmax.f32 (!%p1246_p8), %v1382_v17, -128.0  ;;  %v448_v26 = vmax.f32 (!%p1246_p8), %v1384_v18, -128.0  ;;  %v449_v27 = vmax.f32 (!%p1246_p8), %v1385_v19, -128.0  ;;  %v450_v28 = vmax.f32 (!%p1246_p8), %v1386_v20, -128.0 }
  0x1b   : > { %v419_v29 = vmin.f32 (!%p1246_p8), %v415_v21, 127.0  ;;  %v420_v30 = vmin.f32 (!%p1246_p8), %v416_v22, 127.0  ;;  %v421_v31 = vmin.f32 (!%p1246_p8), %v417_v23, 127.0  ;;  %v451_v32 = vmin.f32 (!%p1246_p8), %v447_v24, 127.0 }
  0x1c   : > { %v422_v33 = vmin.f32 (!%p1246_p8), %v418_v25, 127.0  ;;  %v452_v34 = vmin.f32 (!%p1246_p8), %v448_v26, 127.0  ;;  %v453_v35 = vmin.f32 (!%p1246_p8), %v449_v27, 127.0  ;;  %v454_v36 = vmin.f32 (!%p1246_p8), %v450_v28, 127.0 }
  0x1d   : > { %v423_v37 = vtrunc.f32 (!%p1246_p8), %v419_v29  ;;  %v424_v38 = vtrunc.f32 (!%p1246_p8), %v420_v30  ;;  %v425_v39 = vtrunc.f32 (!%p1246_p8), %v421_v31  ;;  %v455_v40 = vtrunc.f32 (!%p1246_p8), %v451_v32 }
  0x1e   : > { %v426_v41 = vtrunc.f32 %v422_v33  ;;  %v456_v42 = vtrunc.f32 %v452_v34  ;;  %v457_v43 = vtrunc.f32 %v453_v35  ;;  %v458_v44 = vtrunc.f32 %v454_v36 }
  0x1f   : > { %v427_v45 = vpack.c.f32.eXmY %v423_v37, %v424_v38, 312 }
  0x20   : > { %v431_v46 = vpack.c.f32.eXmY %v425_v39, %v426_v41, 312  ;;  %v459_v47 = vpack.c.f32.eXmY %v455_v40, %v456_v42, 312 }
  0x21   : > { %v463_v48 = vpack.c.f32.eXmY %v457_v43, %v458_v44, 312 }
  0x22   : > { %v435_v49 = vpack.c.b8 %v431_v46, %v427_v45 }
  0x23   : > { %v467_v50 = vpack.c.b8 %v463_v48, %v459_v47 }
  0x24   : > { %438 = vst.msk [vmem:[#allocation2] sm:$0xff] %vm437_vm0, %v435_v49 }
  0x25   : > { %469 = vst.msk [vmem:[#allocation3] sm:$0xff] %vm437_vm0, %v467_v50 }
  0x26 PF: > { %v476_v51 = vld [vmem:[%s1637_s18] sm:$0xff]  ;;  %v785_v52 = vld [vmem:[%s1637_s18 + $0x8] sm:$0xff]  ;;  %vm487_vm1 = vcmask 261120   ;;  %v480_v17 = vld [vmem:[%s1662_s20 + $0x10] sm:$0xff]  ;;  %p1267_p9 = scmp.ne.s32.totalorder %s1538_s24, 1 }
  0x27   : > { %v484_v54 = vunpack.c.l.s8.bf16 %v476_v51  ;;  %v485_v55 = vunpack.c.h.s8.bf16 %v476_v51  ;;  %v791_v56 = vunpack.c.l.s8.bf16 %v785_v52  ;;  %v792_v57 = vunpack.c.h.s8.bf16 %v785_v52  ;;  %v477_v59 = vld [vmem:[%s1642_s21] sm:$0xff]  ;;  %v786_v60 = vld [vmem:[%s1642_s21 + $0x8] sm:$0xff]  ;;  %v789_v18 = vld [vmem:[%s1662_s20 + $0x30] sm:$0xff] }
  0x28   : > { %v568_v61 = vunpack.c.l.s8.bf16 %v477_v59  ;;  %v865_v62 = vunpack.c.l.s8.bf16 %v786_v60  ;;  %v569_v1 = vunpack.c.h.s8.bf16 %v477_v59  ;;  %v866_v3 = vunpack.c.h.s8.bf16 %v786_v60  ;;  %v478_v5 = vld [vmem:[%s1662_s20] sm:$0xff]  ;;  %v479_v11 = vld [vmem:[%s1662_s20 + $0x8] sm:$0xff]  ;;  %v481_v23 = vld [vmem:[%s1662_s20 + $0x18] sm:$0xff] }
  0x29   : > { %1307 = vmatprep.subr.bf16.mxu0 %v484_v54  ;;  %1343 = vmatprep.subr.bf16.mxu1 %v791_v56  ;;  %v787_v6 = vld [vmem:[%s1662_s20 + $0x20] sm:$0xff]  ;;  %v716_v7 = vunpack.c.l.s8.bf16 %v478_v5  ;;  %v717_v9 = vunpack.c.h.s8.bf16 %v478_v5  ;;  %v788_v12 = vld [vmem:[%s1662_s20 + $0x28] sm:$0xff]  ;;  %v718_v13 = vunpack.c.l.s8.bf16 %v479_v11  ;;  %v719_v15 = vunpack.c.h.s8.bf16 %v479_v11  ;;  %v790_v24 = vld [vmem:[%s1662_s20 + $0x38] sm:$0xff] }
  0x2a   : > { %1308 = vmatpush3.bf16.msra.mxu0 %v484_v54  ;;  %1344 = vmatpush3.bf16.msra.mxu1 %v791_v56  ;;  %v1007_v8 = vunpack.c.l.s8.bf16 %v787_v6  ;;  %v1008_v10 = vunpack.c.h.s8.bf16 %v787_v6  ;;  %v1009_v14 = vunpack.c.l.s8.bf16 %v788_v12  ;;  %v1010_v16 = vunpack.c.h.s8.bf16 %v788_v12  ;;  %v1259_v54 = vld [vmem:[%s1647_s25 + $0x1] ss:$0 sm:$0xff] }
  0x2b   : > { %v474_v53 = vld [vmem:[#allocation2] sm:$0xff]  ;;  %1309 = vmatprep.subr.bf16.mxu0 %v485_v55  ;;  %1345 = vmatprep.subr.bf16.mxu1 %v792_v57  ;;  %v720_v19 = vunpack.c.l.s8.bf16 %v480_v17  ;;  %v1011_v20 = vunpack.c.l.s8.bf16 %v789_v18  ;;  %v721_v21 = vunpack.c.h.s8.bf16 %v480_v17  ;;  %v1012_v22 = vunpack.c.h.s8.bf16 %v789_v18 }
  0x2c   : > { %v482_v58 = vunpack.c.l.s8.bf16 %v474_v53  ;;  %v475_v63 = vld [vmem:[#allocation3] sm:$0xff]  ;;  %v483_v0 = vunpack.c.h.s8.bf16 %v474_v53  ;;  %v722_v25 = vunpack.c.l.s8.bf16 %v481_v23  ;;  %v1013_v26 = vunpack.c.l.s8.bf16 %v790_v24  ;;  %v1249_v53 = vld [vmem:[%s1647_s25] ss:$0 sm:$0xff] }
  0x2d   : > { %v566_v2 = vunpack.c.l.s8.bf16 %v475_v63  ;;  %v567_v4 = vunpack.c.h.s8.bf16 %v475_v63  ;;  %v723_v27 = vunpack.c.h.s8.bf16 %v481_v23  ;;  %v1014_v28 = vunpack.c.h.s8.bf16 %v790_v24 }
  0x2e   : > { %1311 = vmatprep.mubr.msk.bf16.mxu0 %vm487_vm1, %v482_v58  ;;  %1347 = vmatprep.mubr.msk.bf16.mxu1 %vm487_vm1, %v482_v58 }
  0x2f   : > { %1310 = vmatpush3.bf16.msra.mxu0 %v485_v55  ;;  %1346 = vmatpush3.bf16.msra.mxu1 %v792_v57 }
  0x30   : > { %1315 = vmatprep.subr.bf16.mxu0 %v568_v61  ;;  %1351 = vmatprep.subr.bf16.mxu1 %v865_v62 }
  0x32   : > { %1312 = vmatmul.mubr.msk.bf16.vlgmr.msra.gmra.mrb[0].mxu0 %vm487_vm1, %v483_v0  ;;  %1348 = vmatmul.mubr.msk.bf16.vlgmr.msra.gmra.mrb[0].mxu1 %vm487_vm1, %v483_v0 }
  0x33   : > { %1316 = vmatpush3.bf16.msra.mxu0 %v568_v61  ;;  %1352 = vmatpush3.bf16.msra.mxu1 %v865_v62 }
  0x34   : > { %1317 = vmatprep.subr.bf16.mxu0 %v569_v1  ;;  %1319 = vmatprep.mubr.msk.bf16.mxu0 %vm487_vm1, %v566_v2 }
  0x35   : > { %1353 = vmatprep.subr.bf16.mxu1 %v866_v3  ;;  %1355 = vmatprep.mubr.msk.bf16.mxu1 %vm487_vm1, %v566_v2 }
  0x37   : > { %1318 = vmatpush3.bf16.msra.mxu0 %v569_v1  ;;  %1354 = vmatpush3.bf16.msra.mxu1 %v866_v3 }
  0x38   : > { %1323 = vmatprep.subr.bf16.mxu0 %v716_v7  ;;  %1359 = vmatprep.subr.bf16.mxu1 %v1007_v8 }
  0x3a   : > { %1320 = vmatmul.mubr.msk.bf16.vlgmr.msra.gmra.mrb[4].mxu0 %vm487_vm1, %v567_v4  ;;  %1356 = vmatmul.mubr.msk.bf16.vlgmr.msra.gmra.mrb[4].mxu1 %vm487_vm1, %v567_v4 }
  0x3b   : > { %1324 = vmatpush3.bf16.msra.mxu0 %v716_v7  ;;  %1360 = vmatpush3.bf16.msra.mxu1 %v1007_v8 }
  0x3c   : > { %1325 = vmatprep.subr.bf16.mxu0 %v717_v9  ;;  %1361 = vmatprep.subr.bf16.mxu1 %v1008_v10 }
  0x3f   : > { %1326 = vmatpush3.bf16.msra.mxu0 %v717_v9  ;;  %1362 = vmatpush3.bf16.msra.mxu1 %v1008_v10 }
  0x40   : > { %1327 = vmatprep.subr.bf16.mxu0 %v718_v13  ;;  %1363 = vmatprep.subr.bf16.mxu1 %v1009_v14 }
  0x43   : > { %1328 = vmatpush3.bf16.msra.mxu0 %v718_v13  ;;  %1364 = vmatpush3.bf16.msra.mxu1 %v1009_v14 }
  0x44   : > { %1329 = vmatprep.subr.bf16.mxu0 %v719_v15  ;;  %1365 = vmatprep.subr.bf16.mxu1 %v1010_v16 }
  0x47   : > { %1330 = vmatpush3.bf16.msra.mxu0 %v719_v15  ;;  %1366 = vmatpush3.bf16.msra.mxu1 %v1010_v16 }
  0x48   : > { %1331 = vmatprep.subr.bf16.mxu0 %v720_v19  ;;  %1367 = vmatprep.subr.bf16.mxu1 %v1011_v20 }
  0x4b   : > { %1332 = vmatpush3.bf16.msra.mxu0 %v720_v19  ;;  %1368 = vmatpush3.bf16.msra.mxu1 %v1011_v20 }
  0x4c   : > { %1333 = vmatprep.subr.bf16.mxu0 %v721_v21  ;;  %1369 = vmatprep.subr.bf16.mxu1 %v1012_v22 }
  0x4f   : > { %1334 = vmatpush3.bf16.msra.mxu0 %v721_v21  ;;  %1370 = vmatpush3.bf16.msra.mxu1 %v1012_v22 }
  0x50   : > { %1335 = vmatprep.subr.bf16.mxu0 %v722_v25  ;;  %1371 = vmatprep.subr.bf16.mxu1 %v1013_v26 }
  0x53   : > { %1336 = vmatpush3.bf16.msra.mxu0 %v722_v25  ;;  %1372 = vmatpush3.bf16.msra.mxu1 %v1013_v26 }
  0x54   : > { %1337 = vmatprep.subr.bf16.mxu0 %v723_v27  ;;  %1373 = vmatprep.subr.bf16.mxu1 %v1014_v28 }
  0x57   : > { %1338 = vmatpush3.bf16.msra.mxu0 %v723_v27  ;;  %1374 = vmatpush3.bf16.msra.mxu1 %v1014_v28 }
 0x105   : > { %v1313_v29 = vpop.f32.mrb[0].mxu0  ;;  %v1349_v30 = vpop.f32.mrb[0].mxu1 }
 0x106   : > { %v1391_v31 = vtrunc.f32 %v1313_v29  ;;  %v1419_v32 = vtrunc.f32 %v1349_v30  ;;  %v528_v33 = vpop.f32.mrb[1].mxu0  ;;  %v827_v34 = vpop.f32.mrb[1].mxu1 }
 0x107   : > { %v1387_v35 = vtrunc.f32 %v528_v33  ;;  %v1415_v36 = vtrunc.f32 %v827_v34  ;;  %v1314_v37 = vpop.f32.mrb[2].mxu0  ;;  %v1350_v38 = vpop.f32.mrb[2].mxu1 }
 0x108   : > { %v1392_v39 = vcvt.f32.s32 %v1391_v31  ;;  %v1420_v40 = vcvt.f32.s32 %v1419_v32  ;;  %v1393_v41 = vtrunc.f32 %v1314_v37  ;;  %v1421_v42 = vtrunc.f32 %v1350_v38  ;;  %v531_v43 = vpop.f32.mrb[3].mxu0  ;;  %v830_v44 = vpop.f32.mrb[3].mxu1 }
 0x109   : > { %v1388_v45 = vcvt.f32.s32 %v1387_v35  ;;  %v1416_v46 = vcvt.f32.s32 %v1415_v36  ;;  %v1389_v47 = vtrunc.f32 %v531_v43  ;;  %v1417_v48 = vtrunc.f32 %v830_v44 }
 0x10a   : > { %v549_v49 = vcvt.s32.f32 %v1392_v39  ;;  %v848_v50 = vcvt.s32.f32 %v1420_v40  ;;  %v1394_v51 = vcvt.f32.s32 %v1393_v41  ;;  %v1422_v52 = vcvt.f32.s32 %v1421_v42 }
 0x10b   : > { %v547_v55 = vcvt.s32.f32 %v1388_v45  ;;  %v846_v56 = vcvt.s32.f32 %v1416_v46  ;;  %v1390_v57 = vcvt.f32.s32 %v1389_v47  ;;  %v1418_v58 = vcvt.f32.s32 %v1417_v48 }
 0x10c   : > { %v553_v59 = vmul.f32 0.0003, %v549_v49  ;;  %v852_v60 = vmul.f32 0.0003, %v848_v50  ;;  %v550_v61 = vcvt.s32.f32 %v1394_v51  ;;  %v849_v62 = vcvt.s32.f32 %v1422_v52 }
 0x10d   : > { %v551_v63 = vmul.f32 0.0003, %v547_v55  ;;  %v850_v0 = vmul.f32 0.0003, %v846_v56  ;;  %v548_v1 = vcvt.s32.f32 %v1390_v57  ;;  %v847_v2 = vcvt.s32.f32 %v1418_v58  ;;  %v1321_v3 = vpop.f32.mrb[4].mxu0  ;;  %v1357_v4 = vpop.f32.mrb[4].mxu1 }
 0x10e   : > { %v1693_v5 = vadd.f32 %v1249_v53, %v553_v59  ;;  %v1695_v6 = vadd.f32 %v1259_v54, %v852_v60  ;;  %v554_v7 = vmul.f32 0.0003, %v550_v61  ;;  %v853_v8 = vmul.f32 0.0003, %v849_v62  ;;  %v610_v9 = vpop.f32.mrb[5].mxu0  ;;  %v901_v10 = vpop.f32.mrb[5].mxu1 }
 0x10f   : > { %v1697_v11 = vadd.f32 %v1249_v53, %v551_v63  ;;  %v1699_v12 = vadd.f32 %v1259_v54, %v850_v0  ;;  %v552_v13 = vmul.f32 0.0003, %v548_v1  ;;  %v851_v14 = vmul.f32 0.0003, %v847_v2  ;;  %v1322_v15 = vpop.f32.mrb[6].mxu0  ;;  %v1358_v16 = vpop.f32.mrb[6].mxu1 }
 0x110   : > { %v1255_v17 = vmul.f32 -1.442695, %v1693_v5  ;;  %v1265_v18 = vmul.f32 -1.442695, %v1695_v6  ;;  %v1703_v19 = vadd.f32 %v1249_v53, %v554_v7  ;;  %v1705_v20 = vadd.f32 %v1259_v54, %v853_v8  ;;  %v613_v21 = vpop.f32.mrb[7].mxu0  ;;  %v904_v22 = vpop.f32.mrb[7].mxu1 }
 0x111   : > { %v1253_v23 = vmul.f32 -1.442695, %v1697_v11  ;;  %v1263_v24 = vmul.f32 -1.442695, %v1699_v12  ;;  %v1709_v25 = vadd.f32 %v1249_v53, %v552_v13  ;;  %v1711_v26 = vadd.f32 %v1259_v54, %v851_v14  ;;  %v1262_v14 = vld [vmem:[%s1652_s13 + $0x1] ss:$0 sm:$0xff] }
 0x112   : > { %1484 = vpow2.f32 %v1255_v17  ;;  %v1256_v27 = vmul.f32 -1.442695, %v1703_v19  ;;  %v1266_v28 = vmul.f32 -1.442695, %v1705_v20  ;;  %v1399_v31 = vtrunc.f32 %v1321_v3 }
 0x113   : > { %1486 = vpow2.f32 %v1265_v18  ;;  %v1254_v29 = vmul.f32 -1.442695, %v1709_v25  ;;  %v1264_v30 = vmul.f32 -1.442695, %v1711_v26  ;;  %v1427_v32 = vtrunc.f32 %v1357_v4  ;;  %v1252_v4 = vld [vmem:[%s1652_s13] ss:$0 sm:$0xff] }
 0x114   : > { %1488 = vpow2.f32 %v1253_v23  ;;  %v1395_v33 = vtrunc.f32 %v610_v9  ;;  %v1423_v34 = vtrunc.f32 %v901_v10  ;;  %v1400_v36 = vcvt.f32.s32 %v1399_v31 }
 0x115   : > { %1490 = vpow2.f32 %v1263_v24  ;;  %v1401_v37 = vtrunc.f32 %v1322_v15  ;;  %v1428_v40 = vcvt.f32.s32 %v1427_v32  ;;  %v1429_v41 = vtrunc.f32 %v1358_v16 }
 0x116   : > { %1492 = vpow2.f32 %v1256_v27  ;;  %v1396_v44 = vcvt.f32.s32 %v1395_v33  ;;  %v1397_v45 = vtrunc.f32 %v613_v21  ;;  %v1424_v48 = vcvt.f32.s32 %v1423_v34 }
 0x117   : > { %1494 = vpow2.f32 %v1266_v28  ;;  %v1425_v49 = vtrunc.f32 %v904_v22  ;;  %v631_v52 = vcvt.s32.f32 %v1400_v36  ;;  %v1402_v53 = vcvt.f32.s32 %v1401_v37 }
 0x118   : > { %1496 = vpow2.f32 %v1254_v29  ;;  %v922_v56 = vcvt.s32.f32 %v1428_v40  ;;  %v1430_v57 = vcvt.f32.s32 %v1429_v41  ;;  %v629_v60 = vcvt.s32.f32 %v1396_v44 }
 0x119   : > { %1498 = vpow2.f32 %v1264_v30  ;;  %v1398_v61 = vcvt.f32.s32 %v1397_v45  ;;  %v920_v0 = vcvt.s32.f32 %v1424_v48  ;;  %v1426_v1 = vcvt.f32.s32 %v1425_v49 }
 0x11a   : > { %v635_v3 = vmul.f32 0.00025, %v631_v52  ;;  %v632_v7 = vcvt.s32.f32 %v1402_v53  ;;  %v926_v8 = vmul.f32 0.00025, %v922_v56  ;;  %v923_v9 = vcvt.s32.f32 %v1430_v57 }
 0x11b   : > { %v633_v10 = vmul.f32 0.00025, %v629_v60  ;;  %v630_v13 = vcvt.s32.f32 %v1398_v61  ;;  %v924_v15 = vmul.f32 0.00025, %v920_v0  ;;  %v921_v16 = vcvt.s32.f32 %v1426_v1 }
 0x11c   : > { %v1485_v35 = vpop.eup %1484  ;;  %v646_v17 = vadd.f32 %v1252_v4, %v635_v3  ;;  %v636_v21 = vmul.f32 0.00025, %v632_v7  ;;  %v937_v22 = vadd.f32 %v1262_v14, %v926_v8  ;;  %v927_v23 = vmul.f32 0.00025, %v923_v9 }
 0x11d   : > { %v1487_v38 = vpop.eup %1486  ;;  %v662_v39 = vadd.f32 1.0, %v1485_v35  ;;  %v644_v28 = vadd.f32 %v1252_v4, %v633_v10  ;;  %v634_v29 = vmul.f32 0.00025, %v630_v13  ;;  %v935_v32 = vadd.f32 %v1262_v14, %v924_v15 }
 0x11e   : > { %v1489_v42 = vpop.eup %1488  ;;  %v953_v43 = vadd.f32 1.0, %v1487_v38  ;;  %v925_v33 = vmul.f32 0.00025, %v921_v16  ;;  %v938_v41 = vadd.f32 %v1262_v14, %v927_v23 }
 0x11f   : > { %v1491_v46 = vpop.eup %1490  ;;  %1500 = vrcp.f32 %v662_v39  ;;  %v660_v47 = vadd.f32 1.0, %v1489_v42  ;;  %v647_v39 = vadd.f32 %v1252_v4, %v636_v21  ;;  %v645_v45 = vadd.f32 %v1252_v4, %v634_v29 }
 0x120   : > { %v1493_v50 = vpop.eup %1492  ;;  %1502 = vrcp.f32 %v953_v43  ;;  %v951_v51 = vadd.f32 1.0, %v1491_v46  ;;  %v936_v49 = vadd.f32 %v1262_v14, %v925_v33 }
 0x121   : > { %v1495_v54 = vpop.eup %1494  ;;  %1504 = vrcp.f32 %v660_v47  ;;  %v663_v55 = vadd.f32 1.0, %v1493_v50 }
 0x122   : > { %v1497_v58 = vpop.eup %1496  ;;  %1506 = vrcp.f32 %v951_v51  ;;  %v954_v59 = vadd.f32 1.0, %v1495_v54 }
 0x123   : > { %v1499_v62 = vpop.eup %1498  ;;  %1508 = vrcp.f32 %v663_v55  ;;  %v661_v63 = vadd.f32 1.0, %v1497_v58 }
 0x124   : > { %1510 = vrcp.f32 %v954_v59  ;;  %v952_v2 = vadd.f32 1.0, %v1499_v62 }
 0x125   : > { %1512 = vrcp.f32 %v661_v63 }
 0x126   : > { %1514 = vrcp.f32 %v952_v2 }
 0x129   : > { %v1501_v18 = vpop.eup %1500 }
 0x12a   : > { %v1503_v24 = vpop.eup %1502  ;;  %v674_v27 = vmul.f32 %v1501_v18, %v1693_v5 }
 0x12b   : > { %v1505_v30 = vpop.eup %1504  ;;  %v965_v31 = vmul.f32 %v1503_v24, %v1695_v6 }
 0x12c   : > { %v1507_v34 = vpop.eup %1506  ;;  %v672_v35 = vmul.f32 %v1505_v30, %v1697_v11  ;;  %v678_v36 = vmul.f32 %v674_v27, %v646_v17 }
 0x12d   : > { %v1509_v37 = vpop.eup %1508  ;;  %v963_v38 = vmul.f32 %v1507_v34, %v1699_v12  ;;  %v969_v40 = vmul.f32 %v965_v31, %v937_v22 }
 0x12e   : > { %v1511_v42 = vpop.eup %1510  ;;  %v675_v5 = vmul.f32 %v1509_v37, %v1703_v19  ;;  %v682_v43 = vmul.f32 50.0, %v678_v36  ;;  %v676_v44 = vmul.f32 %v672_v35, %v644_v28 }
 0x12f   : > { %v1513_v46 = vpop.eup %1512  ;;  %v966_v6 = vmul.f32 %v1511_v42, %v1705_v20  ;;  %v973_v47 = vmul.f32 50.0, %v969_v40  ;;  %v967_v48 = vmul.f32 %v963_v38, %v935_v32 }
 0x130   : > { %v1515_v11 = vpop.eup %1514  ;;  %v673_v50 = vmul.f32 %v1513_v46, %v1709_v25  ;;  %v1405_v51 = vround.rtne.f32 %v682_v43  ;;  %v680_v12 = vmul.f32 50.0, %v676_v44  ;;  %v679_v52 = vmul.f32 %v675_v5, %v647_v39  ;;  %v712_v46 = vld [vmem:[#allocation4 + $0x10] sm:$0xff] }
 0x131   : > { %v964_v53 = vmul.f32 %v1515_v11, %v1711_v26  ;;  %v1433_v54 = vround.rtne.f32 %v973_v47  ;;  %v971_v55 = vmul.f32 50.0, %v967_v48  ;;  %v970_v19 = vmul.f32 %v966_v6, %v938_v41  ;;  %v710_v11 = vld [vmem:[#allocation4] sm:$0xff] }
 0x132   : > { %v690_v56 = vmax.f32 %v1405_v51, -128.0  ;;  %v1403_v57 = vround.rtne.f32 %v680_v12  ;;  %v683_v58 = vmul.f32 50.0, %v679_v52  ;;  %v677_v59 = vmul.f32 %v673_v50, %v645_v45 }
 0x133   : > { %v981_v60 = vmax.f32 %v1433_v54, -128.0  ;;  %v1431_v20 = vround.rtne.f32 %v971_v55  ;;  %v974_v61 = vmul.f32 50.0, %v970_v19  ;;  %v968_v62 = vmul.f32 %v964_v53, %v936_v49  ;;  %v713_v53 = vld [vmem:[#allocation4 + $0x18] sm:$0xff] }
 0x134   : > { %v688_v63 = vmax.f32 %v1403_v57, -128.0  ;;  %v1406_v0 = vround.rtne.f32 %v683_v58  ;;  %v681_v1 = vmul.f32 50.0, %v677_v59  ;;  %v694_v4 = vmin.f32 %v690_v56, 127.0  ;;  %v711_v57 = vld [vmem:[#allocation4 + $0x8] sm:$0xff] }
 0x135   : > { %v979_v25 = vmax.f32 %v1431_v20, -128.0  ;;  %v1434_v2 = vround.rtne.f32 %v974_v61  ;;  %v972_v3 = vmul.f32 50.0, %v968_v62  ;;  %v985_v8 = vmin.f32 %v981_v60, 127.0 }
 0x136   : > { %v691_v7 = vmax.f32 %v1406_v0, -128.0  ;;  %v1404_v26 = vround.rtne.f32 %v681_v1  ;;  %v692_v13 = vmin.f32 %v688_v63, 127.0  ;;  %v698_v21 = vtrunc.f32 %v694_v4 }
 0x137   : > { %v982_v9 = vmax.f32 %v1434_v2, -128.0  ;;  %v1432_v10 = vround.rtne.f32 %v972_v3  ;;  %v983_v16 = vmin.f32 %v979_v25, 127.0  ;;  %v989_v24 = vtrunc.f32 %v985_v8 }
 0x138   : > { %v695_v14 = vmin.f32 %v691_v7, 127.0  ;;  %v689_v15 = vmax.f32 %v1404_v26, -128.0  ;;  %v696_v29 = vtrunc.f32 %v692_v13 }
 0x139   : > { %v986_v17 = vmin.f32 %v982_v9, 127.0  ;;  %v980_v18 = vmax.f32 %v1432_v10, -128.0  ;;  %v987_v32 = vtrunc.f32 %v983_v16 }
 0x13a   : > { %v699_v22 = vtrunc.f32 %v695_v14  ;;  %v693_v23 = vmin.f32 %v689_v15, 127.0 }
 0x13b   : > { %v990_v27 = vtrunc.f32 %v986_v17  ;;  %v984_v28 = vmin.f32 %v980_v18, 127.0 }
 0x13c   : > { %v697_v30 = vtrunc.f32 %v693_v23  ;;  %v704_v31 = vpack.c.f32.eXmY %v698_v21, %v699_v22, 312  ;;  %v1268_v23 = vld [vmem:[%s1768_s6] ss:$0 sm:$0xff] (!%p1267_p9) }
 0x13d   : > { %v988_v33 = vtrunc.f32 %v984_v28  ;;  %v995_v34 = vpack.c.f32.eXmY %v989_v24, %v990_v27, 312 }
 0x13e   : > { %v700_v35 = vpack.c.f32.eXmY %v696_v29, %v697_v30, 312 }
 0x13f   : > { %v991_v36 = vpack.c.f32.eXmY %v987_v32, %v988_v33, 312 }
 0x140   : > { %v708_v37 = vpack.c.b8 %v704_v31, %v700_v35 }
 0x141   : > { %v999_v38 = vpack.c.b8 %v995_v34, %v991_v36 }
 0x142   : > { %v714_v39 = vunpack.c.l.s8.bf16 %v708_v37  ;;  %v715_v40 = vunpack.c.h.s8.bf16 %v708_v37 }
 0x143   : > { %v1005_v41 = vunpack.c.l.s8.bf16 %v999_v38  ;;  %v1006_v42 = vunpack.c.h.s8.bf16 %v999_v38 }
 0x144   : > { %1339 = vmatprep.mubr.bf16.mxu0 %v714_v39 }
 0x145   : > { %1375 = vmatprep.mubr.bf16.mxu1 %v1005_v41  ;;  %1340 = vmatmul.mubr.bf16.vlgmr.msra.gmra.mrb[8].mxu0 %v715_v40 }
 0x146   : > { %1376 = vmatmul.mubr.bf16.vlgmr.msra.gmra.mrb[8].mxu1 %v1006_v42 }
 0x218   : > { %v1341_v5 = vpop.f32.mrb[8].mxu0 }
 0x219   : > { %v1411_v43 = vtrunc.f32 %v1341_v5  ;;  %v1377_v44 = vpop.f32.mrb[8].mxu1  ;;  %v758_v45 = vpop.f32.mrb[9].mxu0 }
 0x21a   : > { %v1407_v6 = vtrunc.f32 %v758_v45  ;;  %v1049_v47 = vpop.f32.mrb[9].mxu1  ;;  %v1342_v48 = vpop.f32.mrb[10].mxu0  ;;  %v1439_v61 = vtrunc.f32 %v1377_v44 }
 0x21b   : > { %v1412_v49 = vcvt.f32.s32 %v1411_v43  ;;  %v1413_v50 = vtrunc.f32 %v1342_v48  ;;  %v1378_v51 = vpop.f32.mrb[10].mxu1  ;;  %v761_v12 = vpop.f32.mrb[11].mxu0  ;;  %v1435_v62 = vtrunc.f32 %v1049_v47 }
 0x21c   : > { %v1408_v52 = vcvt.f32.s32 %v1407_v6  ;;  %v1409_v54 = vtrunc.f32 %v761_v12  ;;  %v1052_v55 = vpop.f32.mrb[11].mxu1  ;;  %v1441_v63 = vtrunc.f32 %v1378_v51  ;;  %v1440_v1 = vcvt.f32.s32 %v1439_v61 }
 0x21d   : > { %v779_v19 = vadd.s32 %v1412_v49, %v712_v46  ;;  %v1414_v56 = vcvt.f32.s32 %v1413_v50  ;;  %v1437_v0 = vtrunc.f32 %v1052_v55  ;;  %v1436_v2 = vcvt.f32.s32 %v1435_v62 }
 0x21e   : > { %v777_v58 = vadd.s32 %v1408_v52, %v710_v11  ;;  %v1410_v59 = vcvt.f32.s32 %v1409_v54  ;;  %v1442_v7 = vcvt.f32.s32 %v1441_v63 }
 0x21f   : > { %783 = vst.msk [vmem:[#allocation4 + $0x10] sm:$0xff] %vm487_vm1, %v779_v19  ;;  %v780_v60 = vadd.s32 %v1414_v56, %v713_v53  ;;  %v1438_v9 = vcvt.f32.s32 %v1437_v0 }
 0x220   : > { %781 = vst.msk [vmem:[#allocation4] sm:$0xff] %vm487_vm1, %v777_v58  ;;  %v778_v20 = vadd.s32 %v1410_v59, %v711_v57 }
 0x221   : > { %784 = vst.msk [vmem:[#allocation4 + $0x18] sm:$0xff] %vm487_vm1, %v780_v60 }
 0x222   : > { %782 = vst.msk [vmem:[#allocation4 + $0x8] sm:$0xff] %vm487_vm1, %v778_v20 }
 0x226   : > { %v1003_v25 = vld [vmem:[#allocation4 + $0x10] sm:$0xff]  ;;  %1079 = sbr.rel (%p1267_p9) target bundleno = 571 (0x23b), region = 56 }
 0x227   : > { %v1070_v3 = vadd.s32 %v1440_v1, %v1003_v25  ;;  %v1001_v4 = vld [vmem:[#allocation4] sm:$0xff] }
 0x228   : > { %v1068_v26 = vadd.s32 %v1436_v2, %v1001_v4  ;;  %v1004_v8 = vld [vmem:[#allocation4 + $0x18] sm:$0xff] }
 0x229   : > { %1074 = vst.msk [vmem:[#allocation4 + $0x10] sm:$0xff] %vm487_vm1, %v1070_v3  ;;  %v1071_v10 = vadd.s32 %v1442_v7, %v1004_v8  ;;  %v1002_v13 = vld [vmem:[#allocation4 + $0x8] sm:$0xff] }
 0x22a   : > { %1072 = vst.msk [vmem:[#allocation4] sm:$0xff] %vm487_vm1, %v1068_v26  ;;  %v1069_v14 = vadd.s32 %v1438_v9, %v1002_v13 }
 0x22b   : > { %1075 = vst.msk [vmem:[#allocation4 + $0x18] sm:$0xff] %vm487_vm1, %v1071_v10 }
 0x22c   : > { %1073 = vst.msk [vmem:[#allocation4 + $0x8] sm:$0xff] %vm487_vm1, %v1069_v14 }
 0x230   : > { %v1082_v21 = vld [vmem:[#allocation4 + $0x10] sm:$0xff] }
 0x231   : > { %v1080_v15 = vld [vmem:[#allocation4] sm:$0xff]  ;;  %v1086_v24 = vcvt.s32.f32 %v1082_v21 }
 0x232   : > { %v1084_v17 = vcvt.s32.f32 %v1080_v15  ;;  %v1083_v22 = vld [vmem:[#allocation4 + $0x18] sm:$0xff] }
 0x233   : > { %v1081_v16 = vld [vmem:[#allocation4 + $0x8] sm:$0xff]  ;;  %v1087_v27 = vcvt.s32.f32 %v1083_v22  ;;  %v1090_v30 = vmul.f32 0.0004, %v1086_v24 }
 0x234   : > { %v1085_v18 = vcvt.s32.f32 %v1081_v16  ;;  %v1088_v28 = vmul.f32 0.0004, %v1084_v17 }
 0x235   : > { %v1091_v31 = vmul.f32 0.0004, %v1087_v27  ;;  %v1101_v34 = vadd.f32 %v1268_v23, %v1090_v30 }
 0x236   : > { %v1089_v29 = vmul.f32 0.0004, %v1085_v18  ;;  %v1099_v32 = vadd.f32 %v1268_v23, %v1088_v28 }
 0x237   : > { %v1102_v35 = vadd.f32 %v1268_v23, %v1091_v31  ;;  %1105 = vst.msk [vmem:[%s1657_s1 + $0x10] sm:$0xff] %vm487_vm1, %v1101_v34 }
 0x238   : > { %v1100_v33 = vadd.f32 %v1268_v23, %v1089_v29  ;;  %1103 = vst.msk [vmem:[%s1657_s1] sm:$0xff] %vm487_vm1, %v1099_v32 }
 0x239   : > { %1106 = vst.msk [vmem:[%s1657_s1 + $0x18] sm:$0xff] %vm487_vm1, %v1102_v35 }
 0x23a   : > { %1104 = vst.msk [vmem:[%s1657_s1 + $0x8] sm:$0xff] %vm487_vm1, %v1100_v33 }
 0x23b PF: > { %s17_s28 = sadd.s32 1, %s1554_s28   ;;  %s1774_s24 = smov %s1546_s26 }
 0x23c   : > { %p14_p10 = scmp.ge.s32.totalorder %s17_s28, 6   ;;  %s1775_s25 = smov %s1550_s27 }
 0x23d   : > { %s1776_s26 = smov %s1779_s29  ;;  %s1777_s27 = smov %s1783_s30 }
 0x23e   :  { %16 = sbr.rel (!%p14_p10) target bundleno = 4 (0x4), region = 101 }

</bundles_post_ra>
